<compile_context>
chip_gen: v5e
topology: v5e:2x2
jax: 0.10.0
libtpu: 0.0.40
codegen_flags: <defaults>
</compile_context>

<pallas_src>
import jax
import jax.numpy as jnp
from jax.experimental import pallas as pl
from jax.experimental.pallas import tpu as pltpu

LANES = 128          # lane padding for every hidden feature dimension
N_LAYERS = 5         # fc_1..fc_4 + head
MAX_TILE_B = 512     # batch rows per grid step (<< v7x 64 MiB VMEM budget)


def _mlp_kernel(x_ref, w_ref, v_ref, out_ref):
    """x_ref:[TB,D] f32, w_ref:[5*128,128] (f32|bf16), v_ref:[8,128] f32,
    out_ref:[TB,1] f32.

    v_ref rows: 0 = BN scale, 1 = BN shift, 2..6 = biases(fc1..fc4, head),
    7 = zero pad.  Padded lanes carry exact zeros through the whole network
    (weight / bias pads are zero, swish(0)=0), so no masking is needed.
    """
    D = x_ref.shape[1]
    P = w_ref.shape[1]                    # 128 lanes
    mm_dtype = w_ref.dtype

    # ---- BatchNorm1d as a precomputed per-feature affine: h = x*scale + shift
    x = x_ref[...]                        # [TB, D] f32
    scale = v_ref[0:1, :D]                # [1, D]
    shift = v_ref[1:2, :D]
    h = x * scale + shift                 # [TB, D] f32

    def swish(a):
        # exp + approx reciprocal both on the EUP slot; VALU only does the muls
        return a * pl.reciprocal(1.0 + jnp.exp(-a), approx=True)

    # ---- fc_1 .. fc_4 (+ swish); activations stay f32 between layers ----
    for i in range(N_LAYERS - 1):
        kdim = D if i == 0 else P
        w = w_ref[i * P:i * P + kdim, :]  # static VMEM view
        b = v_ref[2 + i:3 + i, :]         # [1, P] f32
        a = jnp.dot(h.astype(mm_dtype), w,
                    preferred_element_type=jnp.float32) + b
        h = swish(a)                      # [TB, P] f32

    # ---- head (no activation); only lane 0 is real -> store [TB, 1] ----
    w5 = w_ref[(N_LAYERS - 1) * P:N_LAYERS * P, :]
    b5 = v_ref[6:7, :]
    out = jnp.dot(h.astype(mm_dtype), w5,
                  preferred_element_type=jnp.float32) + b5
    out_ref[...] = out[:, 0:1].astype(out_ref.dtype)


def pack_params(p, dim, matmul_dtype=jnp.float32):
    """Pack weights into one lane-padded slab and biases into static rows.

    Returns:
      w_slab:   [5*128, 128] matmul_dtype (zero padded)
      bias_rows:[6, 128] f32  (5 bias rows + 1 zero pad row)
    """
    P = LANES
    w_names = ["w1", "w2", "w3", "w4", "w_head"]
    b_names = ["b1", "b2", "b3", "b4", "b_head"]

    blocks = []
    for wn in w_names:
        w = p[wn]                                               # [in, out]
        blocks.append(jnp.zeros((P, P), jnp.float32)
                      .at[:w.shape[0], :w.shape[1]].set(w))
    w_slab = jnp.concatenate(blocks, axis=0).astype(matmul_dtype)   # [5P, P]

    def row(v):
        v = v.reshape(-1)
        return jnp.zeros((1, P), jnp.float32).at[0, :v.shape[0]].set(v)

    bias_rows = jnp.concatenate([row(p[bn]) for bn in b_names]
                                + [jnp.zeros((1, P), jnp.float32)], axis=0)
    return w_slab, bias_rows                                    # [6, P] f32


def mlp_forward(x, gamma, beta, w_slab, bias_rows):
    """x: [B, D] f32 (D <= 128). Returns [B] f32 (head output, squeezed)."""
    B, D = x.shape
    P = LANES
    assert D <= P, "model_input must be <= 128 for this single-lane-tile kernel"
    eps = 1e-5

    # --- BN batch statistics hoisted out of the kernel (tiny XLA reduction) ---
    xf = x.astype(jnp.float32)
    mean = jnp.mean(xf, axis=0)
    var = jnp.maximum(jnp.mean(jnp.square(xf - mean[None, :]), axis=0), 0.0)
    scale = gamma * jax.lax.rsqrt(var + eps)
    shift = beta - mean * scale
    sc_row = jnp.zeros((1, P), jnp.float32).at[0, :D].set(scale)
    sh_row = jnp.zeros((1, P), jnp.float32).at[0, :D].set(shift)
    v_slab = jnp.concatenate([sc_row, sh_row, bias_rows], axis=0)    # [8, P]

    # --- batch tiling: weight/vector slabs VMEM-resident, x/out pipelined ---
    tile_b = B if B <= MAX_TILE_B else MAX_TILE_B
    grid = (pl.cdiv(B, tile_b),)

    flops = 2 * B * P * (D + (N_LAYERS - 1) * P)
    transcend = 2 * (N_LAYERS - 1) * B * P          # exp + approx reciprocal
    bytes_accessed = (B * D * 4 + w_slab.size * w_slab.dtype.itemsize
                      + v_slab.size * 4 + B * 4)

    out = pl.pallas_call(
        _mlp_kernel,
        out_shape=jax.ShapeDtypeStruct((B, 1), jnp.float32),
        grid=grid,
        in_specs=[
            pl.BlockSpec((tile_b, D), lambda i: (i, 0)),
            pl.BlockSpec((N_LAYERS * P, P), lambda i: (0, 0)),   # resident
            pl.BlockSpec((8, P), lambda i: (0, 0)),              # resident
        ],
        out_specs=pl.BlockSpec((tile_b, 1), lambda i: (i, 0)),
        compiler_params=pltpu.CompilerParams(
            dimension_semantics=("parallel",),        # 2 TCs on v7x
            vmem_limit_bytes=32 * 1024 * 1024),
        cost_estimate=pl.CostEstimate(flops=flops,
                                      transcendentals=transcend,
                                      bytes_accessed=bytes_accessed),
    )(xf, w_slab, v_slab)
    return out[:, 0]                                  # squeeze(1): free reshape


def init_params(key, dim):
    """Deterministic synthetic parameters matching the PyTorch module shapes."""
    dims = [dim, dim, dim // 2, dim // 4, dim // 8, 1]
    ks = jax.random.split(key, len(dims) - 1)

    def lin(k, fan_in, fan_out):
        bound = 1.0 / jnp.sqrt(float(fan_in))
        kw, kb = jax.random.split(k)
        w = jax.random.uniform(kw, (fan_in, fan_out), jnp.float32, -bound, bound)
        b = jax.random.uniform(kb, (fan_out,), jnp.float32, -bound, bound)
        return w, b

    p = {"gamma": jnp.ones((dim,), jnp.float32),
         "beta": jnp.zeros((dim,), jnp.float32)}
    names = [("w1", "b1"), ("w2", "b2"), ("w3", "b3"), ("w4", "b4"),
             ("w_head", "b_head")]
    for i, (wn, bn) in enumerate(names):
        w, b = lin(ks[i], dims[i], dims[i + 1])
        p[wn], p[bn] = w, b
    return p


def _reference(x, p):
    """Pure-JAX reference of the same forward pass (training-mode BN)."""
    eps = 1e-5
    m = jnp.mean(x, 0, keepdims=True)
    v = jnp.var(x, 0, keepdims=True)
    h = (x - m) / jnp.sqrt(v + eps) * p["gamma"] + p["beta"]

    def swish(a):
        return a * (1.0 / (1.0 + jnp.exp(-a)))

    h = swish(h @ p["w1"] + p["b1"])
    h = swish(h @ p["w2"] + p["b2"])
    h = swish(h @ p["w3"] + p["b3"])
    h = swish(h @ p["w4"] + p["b4"])
    return (h @ p["w_head"] + p["b_head"])[:, 0]


if __name__ == "__main__":
    key = jax.random.PRNGKey(0)
    kx, kp = jax.random.split(key)

    batch, dim = 8, 32                      # model_input = 32 -> 32/16/8/4/1
    x = jax.random.normal(kx, (batch, dim), jnp.float32)
    params = init_params(kp, dim)
    ref = _reference(x, params)

    fwd = jax.jit(mlp_forward)

    # fp32 matmul path (matches the fp32 PyTorch forward; swish uses EUP
    # approx reciprocal, hence the slightly loosened tolerance).
    w_slab, bias_rows = pack_params(params, dim, matmul_dtype=jnp.float32)
    out = jax.block_until_ready(
        fwd(x, params["gamma"], params["beta"], w_slab, bias_rows))
    assert out.shape == (batch,)
    assert jnp.allclose(out, ref, atol=1e-2, rtol=1e-2), "fp32 path mismatch"

    # bf16 matmul path (amp; valid on v5e/v6e/v7x MXUs, halves weight-DMA
    # bytes).  BN + swish stay f32.
    w_slab_bf16, bias_rows2 = pack_params(params, dim, matmul_dtype=jnp.bfloat16)
    out_bf16 = jax.block_until_ready(
        fwd(x, params["gamma"], params["beta"], w_slab_bf16, bias_rows2))
    assert out_bf16.shape == (batch,)
    assert bool(jnp.all(jnp.isfinite(out_bf16)))
    assert jnp.allclose(out_bf16, ref, atol=2e-1, rtol=2e-1), "bf16 path mismatch"

    print("KERNEL_OK")
</pallas_src>

<mosaic_0001>
module attributes {stable_mosaic.version = 11 : i64} {
  func.func @_mlp_kernel(%arg0: i32, %arg1: memref<8x32xf32, #tpu.memory_space<vmem>>, %arg2: memref<640x128xf32, #tpu.memory_space<vmem>>, %arg3: memref<8x128xf32, #tpu.memory_space<vmem>>, %arg4: memref<8x1xf32, #tpu.memory_space<vmem>>) attributes {dimension_semantics = [#tpu.dimension_semantics<parallel>], iteration_bounds = array<i64: 1>, scalar_prefetch = 0 : i64, scratch_operands = 0 : i64, tpu.core_type = #tpu.core_type<tc>, window_params = [{transform_indices = @transform_0, window_bounds = array<i64: 8, 32>}, {pipeline_mode = #tpu.pipeline_mode<synchronous>, transform_indices = @transform_1, window_bounds = array<i64: 640, 128>}, {pipeline_mode = #tpu.pipeline_mode<synchronous>, transform_indices = @transform_2, window_bounds = array<i64: 8, 128>}, {transform_indices = @transform_3, window_bounds = array<i64: 8, 1>}]} {
    %c0 = arith.constant 0 : index
    %c0_0 = arith.constant 0 : index
    %0 = vector.load %arg1[%c0, %c0_0] : memref<8x32xf32, #tpu.memory_space<vmem>>, vector<8x32xf32>
    %c0_1 = arith.constant 0 : index
    %c0_2 = arith.constant 0 : index
    %1 = vector.load %arg3[%c0_1, %c0_2] : memref<8x128xf32, #tpu.memory_space<vmem>>, vector<1x32xf32>
    %c1 = arith.constant 1 : index
    %c0_3 = arith.constant 0 : index
    %2 = vector.load %arg3[%c1, %c0_3] : memref<8x128xf32, #tpu.memory_space<vmem>>, vector<1x32xf32>
    %3 = vector.broadcast %1 : vector<1x32xf32> to vector<8x32xf32>
    %4 = arith.mulf %0, %3 : vector<8x32xf32>
    %5 = vector.broadcast %2 : vector<1x32xf32> to vector<8x32xf32>
    %6 = arith.addf %4, %5 : vector<8x32xf32>
    %c0_4 = arith.constant 0 : index
    %c0_5 = arith.constant 0 : index
    %7 = vector.load %arg2[%c0_4, %c0_5] : memref<640x128xf32, #tpu.memory_space<vmem>>, vector<32x128xf32>
    %c2 = arith.constant 2 : index
    %c0_6 = arith.constant 0 : index
    %8 = vector.load %arg3[%c2, %c0_6] : memref<8x128xf32, #tpu.memory_space<vmem>>, vector<1x128xf32>
    %cst = arith.constant dense<0.000000e+00> : vector<8x128xf32>
    %9 = tpu.matmul %6, %7, %cst {dimension_numbers = #tpu.dot_dimension_numbers<[1], [0], [0], [1], [0, 0, 1, 1], [], []>} : vector<8x32xf32>, vector<32x128xf32>, vector<8x128xf32> -> vector<8x128xf32>
    %10 = vector.broadcast %8 : vector<1x128xf32> to vector<8x128xf32>
    %11 = arith.addf %9, %10 : vector<8x128xf32>
    %cst_7 = arith.constant 0.000000e+00 : f32
    %12 = vector.broadcast %cst_7 : f32 to vector<8x128xf32>
    %13 = arith.subf %12, %11 : vector<8x128xf32>
    %14 = math.exp %13 : vector<8x128xf32>
    %cst_8 = arith.constant 1.000000e+00 : f32
    %15 = vector.broadcast %cst_8 : f32 to vector<8x128xf32>
    %16 = arith.addf %15, %14 : vector<8x128xf32>
    %17 = tpu.reciprocal %16 {approx = true} : vector<8x128xf32> -> vector<8x128xf32>
    %18 = arith.mulf %11, %17 : vector<8x128xf32>
    %c128 = arith.constant 128 : index
    %c0_9 = arith.constant 0 : index
    %19 = vector.load %arg2[%c128, %c0_9] : memref<640x128xf32, #tpu.memory_space<vmem>>, vector<128x128xf32>
    %c3 = arith.constant 3 : index
    %c0_10 = arith.constant 0 : index
    %20 = vector.load %arg3[%c3, %c0_10] : memref<8x128xf32, #tpu.memory_space<vmem>>, vector<1x128xf32>
    %cst_11 = arith.constant dense<0.000000e+00> : vector<8x128xf32>
    %21 = tpu.matmul %18, %19, %cst_11 {dimension_numbers = #tpu.dot_dimension_numbers<[1], [0], [0], [1], [0, 0, 1, 1], [], []>} : vector<8x128xf32>, vector<128x128xf32>, vector<8x128xf32> -> vector<8x128xf32>
    %22 = vector.broadcast %20 : vector<1x128xf32> to vector<8x128xf32>
    %23 = arith.addf %21, %22 : vector<8x128xf32>
    %cst_12 = arith.constant 0.000000e+00 : f32
    %24 = vector.broadcast %cst_12 : f32 to vector<8x128xf32>
    %25 = arith.subf %24, %23 : vector<8x128xf32>
    %26 = math.exp %25 : vector<8x128xf32>
    %cst_13 = arith.constant 1.000000e+00 : f32
    %27 = vector.broadcast %cst_13 : f32 to vector<8x128xf32>
    %28 = arith.addf %27, %26 : vector<8x128xf32>
    %29 = tpu.reciprocal %28 {approx = true} : vector<8x128xf32> -> vector<8x128xf32>
    %30 = arith.mulf %23, %29 : vector<8x128xf32>
    %c256 = arith.constant 256 : index
    %c0_14 = arith.constant 0 : index
    %31 = vector.load %arg2[%c256, %c0_14] : memref<640x128xf32, #tpu.memory_space<vmem>>, vector<128x128xf32>
    %c4 = arith.constant 4 : index
    %c0_15 = arith.constant 0 : index
    %32 = vector.load %arg3[%c4, %c0_15] : memref<8x128xf32, #tpu.memory_space<vmem>>, vector<1x128xf32>
    %cst_16 = arith.constant dense<0.000000e+00> : vector<8x128xf32>
    %33 = tpu.matmul %30, %31, %cst_16 {dimension_numbers = #tpu.dot_dimension_numbers<[1], [0], [0], [1], [0, 0, 1, 1], [], []>} : vector<8x128xf32>, vector<128x128xf32>, vector<8x128xf32> -> vector<8x128xf32>
    %34 = vector.broadcast %32 : vector<1x128xf32> to vector<8x128xf32>
    %35 = arith.addf %33, %34 : vector<8x128xf32>
    %cst_17 = arith.constant 0.000000e+00 : f32
    %36 = vector.broadcast %cst_17 : f32 to vector<8x128xf32>
    %37 = arith.subf %36, %35 : vector<8x128xf32>
    %38 = math.exp %37 : vector<8x128xf32>
    %cst_18 = arith.constant 1.000000e+00 : f32
    %39 = vector.broadcast %cst_18 : f32 to vector<8x128xf32>
    %40 = arith.addf %39, %38 : vector<8x128xf32>
    %41 = tpu.reciprocal %40 {approx = true} : vector<8x128xf32> -> vector<8x128xf32>
    %42 = arith.mulf %35, %41 : vector<8x128xf32>
    %c384 = arith.constant 384 : index
    %c0_19 = arith.constant 0 : index
    %43 = vector.load %arg2[%c384, %c0_19] : memref<640x128xf32, #tpu.memory_space<vmem>>, vector<128x128xf32>
    %c5 = arith.constant 5 : index
    %c0_20 = arith.constant 0 : index
    %44 = vector.load %arg3[%c5, %c0_20] : memref<8x128xf32, #tpu.memory_space<vmem>>, vector<1x128xf32>
    %cst_21 = arith.constant dense<0.000000e+00> : vector<8x128xf32>
    %45 = tpu.matmul %42, %43, %cst_21 {dimension_numbers = #tpu.dot_dimension_numbers<[1], [0], [0], [1], [0, 0, 1, 1], [], []>} : vector<8x128xf32>, vector<128x128xf32>, vector<8x128xf32> -> vector<8x128xf32>
    %46 = vector.broadcast %44 : vector<1x128xf32> to vector<8x128xf32>
    %47 = arith.addf %45, %46 : vector<8x128xf32>
    %cst_22 = arith.constant 0.000000e+00 : f32
    %48 = vector.broadcast %cst_22 : f32 to vector<8x128xf32>
    %49 = arith.subf %48, %47 : vector<8x128xf32>
    %50 = math.exp %49 : vector<8x128xf32>
    %cst_23 = arith.constant 1.000000e+00 : f32
    %51 = vector.broadcast %cst_23 : f32 to vector<8x128xf32>
    %52 = arith.addf %51, %50 : vector<8x128xf32>
    %53 = tpu.reciprocal %52 {approx = true} : vector<8x128xf32> -> vector<8x128xf32>
    %54 = arith.mulf %47, %53 : vector<8x128xf32>
    %c512 = arith.constant 512 : index
    %c0_24 = arith.constant 0 : index
    %55 = vector.load %arg2[%c512, %c0_24] : memref<640x128xf32, #tpu.memory_space<vmem>>, vector<128x128xf32>
    %c6 = arith.constant 6 : index
    %c0_25 = arith.constant 0 : index
    %56 = vector.load %arg3[%c6, %c0_25] : memref<8x128xf32, #tpu.memory_space<vmem>>, vector<1x128xf32>
    %cst_26 = arith.constant dense<0.000000e+00> : vector<8x128xf32>
    %57 = tpu.matmul %54, %55, %cst_26 {dimension_numbers = #tpu.dot_dimension_numbers<[1], [0], [0], [1], [0, 0, 1, 1], [], []>} : vector<8x128xf32>, vector<128x128xf32>, vector<8x128xf32> -> vector<8x128xf32>
    %58 = vector.broadcast %56 : vector<1x128xf32> to vector<8x128xf32>
    %59 = arith.addf %57, %58 : vector<8x128xf32>
    %60 = vector.extract_strided_slice %59 {offsets = [0, 0], sizes = [8, 1], strides = [1, 1]} : vector<8x128xf32> to vector<8x1xf32>
    %c0_27 = arith.constant 0 : index
    %c0_28 = arith.constant 0 : index
    %61 = vector.load %arg4[%c0_27, %c0_28] : memref<8x1xf32, #tpu.memory_space<vmem>>, vector<8x1xf32>
    tpu.vector_store %arg4[%c0_27, %c0_28], %60 {strides = array<i32>} : memref<8x1xf32, #tpu.memory_space<vmem>>, vector<8x1xf32>,
    return
  }
  func.func @transform_0(%arg0: i32) -> (i32, i32) {
    %c0_i32 = arith.constant 0 : i32
    %c0_i32_0 = arith.constant 0 : i32
    return %arg0, %c0_i32 : i32, i32
  }
  func.func @transform_1(%arg0: i32) -> (i32, i32) {
    %c0_i32 = arith.constant 0 : i32
    %c0_i32_0 = arith.constant 0 : i32
    %c0_i32_1 = arith.constant 0 : i32
    return %c0_i32, %c0_i32_0 : i32, i32
  }
  func.func @transform_2(%arg0: i32) -> (i32, i32) {
    %c0_i32 = arith.constant 0 : i32
    %c0_i32_0 = arith.constant 0 : i32
    %c0_i32_1 = arith.constant 0 : i32
    return %c0_i32, %c0_i32_0 : i32, i32
  }
  func.func @transform_3(%arg0: i32) -> (i32, i32) {
    %c0_i32 = arith.constant 0 : i32
    %c0_i32_0 = arith.constant 0 : i32
    return %arg0, %c0_i32 : i32, i32
  }
}

</mosaic_0001>

<bundles_post_ra>
// kernel: mlp_forward.1
= control target key start
LH: loop header
LB: loop body
LE: loop exit
PB: predicated region body
PF: predicated region fallthrough
CT: control target
= control target key end

     0   :  { %8 = vsyncpa [#allocation3], 0  ;;  %s303_s15 = smov [#allocation2]   ;;  %s304_s17 = smov 128   ;;  %s356_s0 = inlined_call_operand.vmem [shape: f32[8,32], index: 0, kind: input, shape index: {}]   ;;  %s357_s1 = inlined_call_operand.hbm [shape: f32[640,128], index: 1, kind: input, shape index: {}]   ;;  %s358_s2 = inlined_call_operand.vmem [shape: f32[8,128], index: 2, kind: input, shape index: {}]   ;;  %s359_s3 = inlined_call_operand.vmem [shape: f32[8,1], index: 3, kind: output, shape index: {}]  }
   0x1   :  { %s15_s14 = sshll.u32 %s357_s1, 4  ;;  %s17_s16 = sshll.u32 %s303_s15, 4  ;;  %s16_s14 = int_to_ptr.hbm [resolvable:$true] %s15_s14  ;;  %s18_s16 = int_to_ptr.vmem [resolvable:$true] %s17_s16 }
   0x2   :  { %s305_s18 = smov 8  }
   0x3   :  { %23 = dma.hbm_to_vmem [thread:$0]  %s16_s14, 10240, %s18_s16, [#allocation3], %s304_s17, %s304_s17, %s305_s18  }
   0x4   :  { %301 = dma.done.wait [#allocation3], 10240  }
   0x5   :  { %302 = vsyncadd [#allocation3], 4294957056  ;;  %v40_v0 = vld [vmem:[#allocation2 + $0x18] sm:$0xff]  ;;  %v39_v1 = vld [vmem:[#allocation2 + $0x10] sm:$0xff]  ;;  %vm43_vm0 = vcmask 261120   ;;  %vm243_vm1 = vcmask 7168  }
   0x6   :  { %59 = vmatpush.msra.mxu0 %v40_v0  ;;  %v38_v2 = vld [vmem:[#allocation2 + $0x8] sm:$0xff]  ;;  %v30_v3 = vld [vmem:[%s356_s0] sm:$0xff]  ;;  %v88_v7 = vld [vmem:[#allocation2 + $0xf8] sm:$0xff] }
   0x7   :  { %v254_v4 = vld [vmem:[%s358_s2] ss:$0 sm:$0xff]  ;;  %v255_v5 = vld [vmem:[%s358_s2 + $0x1] ss:$0 sm:$0xff]  ;;  %v87_v8 = vld [vmem:[#allocation2 + $0xf0] sm:$0xff]  ;;  %91 = vmatpush.msra.mxu1 %v88_v7 }
   0x8   :  { %60 = vmatpush.msra.mxu0 %v39_v1  ;;  %v37_v6 = vld [vmem:[#allocation2] sm:$0xff]  ;;  %v34_v9 = vmul.f32 %v254_v4, %v30_v3  ;;  %v86_v10 = vld [vmem:[#allocation2 + $0xe8] sm:$0xff]  ;;  %v84_v13 = vld [vmem:[#allocation2 + $0xd8] sm:$0xff] }
   0x9   :  { %92 = vmatpush.msra.mxu1 %v87_v8  ;;  %v85_v12 = vld [vmem:[#allocation2 + $0xe0] sm:$0xff]  ;;  %v83_v14 = vld [vmem:[#allocation2 + $0xd0] sm:$0xff]  ;;  %v82_v15 = vld [vmem:[#allocation2 + $0xc8] sm:$0xff] }
   0xa   :  { %61 = vmatpush.msra.mxu0 %v38_v2  ;;  %v36_v11 = vadd.f32 %v255_v5, %v34_v9  ;;  %v81_v16 = vld [vmem:[#allocation2 + $0xc0] sm:$0xff]  ;;  %v80_v17 = vld [vmem:[#allocation2 + $0xb8] sm:$0xff]  ;;  %v79_v18 = vld [vmem:[#allocation2 + $0xb0] sm:$0xff] }
   0xb   :  { %93 = vmatpush.msra.mxu1 %v86_v10  ;;  %v78_v19 = vld [vmem:[#allocation2 + $0xa8] sm:$0xff]  ;;  %v77_v20 = vld [vmem:[#allocation2 + $0xa0] sm:$0xff]  ;;  %v76_v21 = vld [vmem:[#allocation2 + $0x98] sm:$0xff] }
   0xc   :  { %62 = vmatpush.msra.mxu0 %v37_v6  ;;  %v75_v22 = vld [vmem:[#allocation2 + $0x90] sm:$0xff]  ;;  %v74_v23 = vld [vmem:[#allocation2 + $0x88] sm:$0xff]  ;;  %v73_v24 = vld [vmem:[#allocation2 + $0x80] sm:$0xff] }
   0xd   :  { %250 = vmatmul.msk.f32.vlgmr.msra.gmra.mxu0 %vm43_vm0, %v36_v11  ;;  %94 = vmatpush.msra.mxu1 %v85_v12  ;;  %v132_v25 = vld [vmem:[#allocation2 + $0x178] sm:$0xff]  ;;  %v131_v26 = vld [vmem:[#allocation2 + $0x170] sm:$0xff]  ;;  %v130_v27 = vld [vmem:[#allocation2 + $0x168] sm:$0xff] }
   0xe   :  { %135 = vmatpush.msra.mxu2 %v132_v25  ;;  %v256_v28 = vld [vmem:[%s358_s2 + $0x2] ss:$0 sm:$0xff]  ;;  %v128_v38 = vld [vmem:[#allocation2 + $0x158] sm:$0xff]  ;;  %v127_v39 = vld [vmem:[#allocation2 + $0x150] sm:$0xff] }
   0xf   :  { %95 = vmatpush.msra.mxu1 %v84_v13  ;;  %v129_v37 = vld [vmem:[#allocation2 + $0x160] sm:$0xff]  ;;  %v126_v40 = vld [vmem:[#allocation2 + $0x148] sm:$0xff]  ;;  %v124_v42 = vld [vmem:[#allocation2 + $0x138] sm:$0xff] }
  0x10   :  { %136 = vmatpush.msra.mxu2 %v131_v26  ;;  %v125_v41 = vld [vmem:[#allocation2 + $0x140] sm:$0xff]  ;;  %v123_v43 = vld [vmem:[#allocation2 + $0x130] sm:$0xff]  ;;  %v122_v44 = vld [vmem:[#allocation2 + $0x128] sm:$0xff] }
  0x11   :  { %96 = vmatpush.msra.mxu1 %v83_v14  ;;  %v121_v45 = vld [vmem:[#allocation2 + $0x120] sm:$0xff]  ;;  %v120_v46 = vld [vmem:[#allocation2 + $0x118] sm:$0xff]  ;;  %v119_v47 = vld [vmem:[#allocation2 + $0x110] sm:$0xff] }
  0x12   :  { %137 = vmatpush.msra.mxu2 %v130_v27  ;;  %v118_v48 = vld [vmem:[#allocation2 + $0x108] sm:$0xff]  ;;  %v117_v49 = vld [vmem:[#allocation2 + $0x100] sm:$0xff]  ;;  %v176_v50 = vld [vmem:[#allocation2 + $0x1f8] sm:$0xff] }
  0x13   :  { %97 = vmatpush.msra.mxu1 %v82_v15  ;;  %v175_v51 = vld [vmem:[#allocation2 + $0x1f0] sm:$0xff]  ;;  %179 = vmatpush.msra.mxu3 %v176_v50  ;;  %v174_v52 = vld [vmem:[#allocation2 + $0x1e8] sm:$0xff]  ;;  %v257_v53 = vld [vmem:[%s358_s2 + $0x3] ss:$0 sm:$0xff] }
  0x14   :  { %138 = vmatpush.msra.mxu2 %v129_v37  ;;  %v173_v62 = vld [vmem:[#allocation2 + $0x1e0] sm:$0xff]  ;;  %v172_v63 = vld [vmem:[#allocation2 + $0x1d8] sm:$0xff]  ;;  %v171_v0 = vld [vmem:[#allocation2 + $0x1d0] sm:$0xff] }
  0x15   :  { %98 = vmatpush.msra.mxu1 %v81_v16  ;;  %180 = vmatpush.msra.mxu3 %v175_v51  ;;  %v170_v1 = vld [vmem:[#allocation2 + $0x1c8] sm:$0xff]  ;;  %v169_v2 = vld [vmem:[#allocation2 + $0x1c0] sm:$0xff]  ;;  %v168_v3 = vld [vmem:[#allocation2 + $0x1b8] sm:$0xff] }
  0x16   :  { %139 = vmatpush.msra.mxu2 %v128_v38  ;;  %v167_v4 = vld [vmem:[#allocation2 + $0x1b0] sm:$0xff]  ;;  %v166_v5 = vld [vmem:[#allocation2 + $0x1a8] sm:$0xff]  ;;  %v165_v6 = vld [vmem:[#allocation2 + $0x1a0] sm:$0xff] }
  0x17   :  { %99 = vmatpush.msra.mxu1 %v80_v17  ;;  %181 = vmatpush.msra.mxu3 %v174_v52  ;;  %v164_v7 = vld [vmem:[#allocation2 + $0x198] sm:$0xff]  ;;  %v163_v8 = vld [vmem:[#allocation2 + $0x190] sm:$0xff]  ;;  %v162_v9 = vld [vmem:[#allocation2 + $0x188] sm:$0xff] }
  0x18   :  { %140 = vmatpush.msra.mxu2 %v127_v39  ;;  %v161_v10 = vld [vmem:[#allocation2 + $0x180] sm:$0xff]  ;;  %v220_v11 = vld [vmem:[#allocation2 + $0x278] sm:$0xff]  ;;  %v219_v12 = vld [vmem:[#allocation2 + $0x270] sm:$0xff] }
  0x19   :  { %100 = vmatpush.msra.mxu1 %v79_v18  ;;  %182 = vmatpush.msra.mxu3 %v173_v62  ;;  %v218_v13 = vld [vmem:[#allocation2 + $0x268] sm:$0xff]  ;;  %v258_v14 = vld [vmem:[%s358_s2 + $0x4] ss:$0 sm:$0xff]  ;;  %v215_v25 = vld [vmem:[#allocation2 + $0x250] sm:$0xff] }
  0x1a   :  { %141 = vmatpush.msra.mxu2 %v126_v40  ;;  %223 = vmatpush.msrb.mxu0 %v220_v11  ;;  %v214_v26 = vld [vmem:[#allocation2 + $0x248] sm:$0xff]  ;;  %v213_v27 = vld [vmem:[#allocation2 + $0x240] sm:$0xff] }
  0x1b   :  { %101 = vmatpush.msra.mxu1 %v78_v19  ;;  %183 = vmatpush.msra.mxu3 %v172_v63 }
  0x1c   :  { %142 = vmatpush.msra.mxu2 %v125_v41  ;;  %224 = vmatpush.msrb.mxu0 %v219_v12 }
  0x1d   :  { %102 = vmatpush.msra.mxu1 %v77_v20  ;;  %184 = vmatpush.msra.mxu3 %v171_v0 }
  0x1e   :  { %143 = vmatpush.msra.mxu2 %v124_v42  ;;  %225 = vmatpush.msrb.mxu0 %v218_v13 }
  0x1f   :  { %103 = vmatpush.msra.mxu1 %v76_v21  ;;  %185 = vmatpush.msra.mxu3 %v170_v1 }
  0x20   :  { %144 = vmatpush.msra.mxu2 %v123_v43 }
  0x21   :  { %104 = vmatpush.msra.mxu1 %v75_v22  ;;  %186 = vmatpush.msra.mxu3 %v169_v2 }
  0x22   :  { %145 = vmatpush.msra.mxu2 %v122_v44 }
  0x23   :  { %105 = vmatpush.msra.mxu1 %v74_v23  ;;  %187 = vmatpush.msra.mxu3 %v168_v3  ;;  %v217_v23 = vld [vmem:[#allocation2 + $0x260] sm:$0xff] }
  0x24   :  { %146 = vmatpush.msra.mxu2 %v121_v45  ;;  %226 = vmatpush.msrb.mxu0 %v217_v23  ;;  %v260_v45 = vld [vmem:[%s358_s2 + $0x6] ss:$0 sm:$0xff] }
  0x25   :  { %106 = vmatpush.msra.mxu1 %v73_v24  ;;  %188 = vmatpush.msra.mxu3 %v167_v4  ;;  %v216_v24 = vld [vmem:[#allocation2 + $0x258] sm:$0xff] }
  0x26   :  { %147 = vmatpush.msra.mxu2 %v120_v46  ;;  %227 = vmatpush.msrb.mxu0 %v216_v24 }
  0x27   :  { %189 = vmatpush.msra.mxu3 %v166_v5 }
  0x28   :  { %148 = vmatpush.msra.mxu2 %v119_v47  ;;  %228 = vmatpush.msrb.mxu0 %v215_v25 }
  0x29   :  { %190 = vmatpush.msra.mxu3 %v165_v6 }
  0x2a   :  { %149 = vmatpush.msra.mxu2 %v118_v48  ;;  %229 = vmatpush.msrb.mxu0 %v214_v26 }
  0x2b   :  { %191 = vmatpush.msra.mxu3 %v164_v7 }
  0x2c   :  { %150 = vmatpush.msra.mxu2 %v117_v49  ;;  %230 = vmatpush.msrb.mxu0 %v213_v27 }
  0x2d   :  { %192 = vmatpush.msra.mxu3 %v163_v8 }
  0x2f   :  { %193 = vmatpush.msra.mxu3 %v162_v9 }
  0x31   :  { %194 = vmatpush.msra.mxu3 %v161_v10 }
  0x8a   :  { %v64_v29 = vpop.f32.mrf.mxu0 }
  0x8b   :  { %v65_v30 = vadd.f32 %v256_v28, %v64_v29  ;;  %v212_v28 = vld [vmem:[#allocation2 + $0x238] sm:$0xff]  ;;  %v211_v29 = vld [vmem:[#allocation2 + $0x230] sm:$0xff] }
  0x8c   :  { %231 = vmatpush.msrb.mxu0 %v212_v28 }
  0x8d   :  { %v67_v31 = vsub.f32 0.0, %v65_v30 }
  0x8e   :  { %232 = vmatpush.msrb.mxu0 %v211_v29 }
  0x8f   :  { %v68_v32 = vmul.f32 1.442695, %v67_v31  ;;  %v209_v31 = vld [vmem:[#allocation2 + $0x220] sm:$0xff] }
  0x91   :  { %261 = vpow2.f32 %v68_v32  ;;  %v208_v32 = vld [vmem:[#allocation2 + $0x218] sm:$0xff] }
  0x97   :  { %v262_v33 = vpop.eup %261 }
  0x98   :  { %v70_v34 = vadd.f32 1.0, %v262_v33  ;;  %v207_v33 = vld [vmem:[#allocation2 + $0x210] sm:$0xff] }
  0x9a   :  { %263 = vrcp.f32 %v70_v34  ;;  %v206_v34 = vld [vmem:[#allocation2 + $0x208] sm:$0xff] }
  0xa0   :  { %v264_v35 = vpop.eup %263 }
  0xa1   :  { %v72_v36 = vmul.f32 %v264_v35, %v65_v30  ;;  %v210_v30 = vld [vmem:[#allocation2 + $0x228] sm:$0xff]  ;;  %v205_v35 = vld [vmem:[#allocation2 + $0x200] sm:$0xff] }
  0xa2   :  { %233 = vmatpush.msrb.mxu0 %v210_v30 }
  0xa3   :  { %107 = vmatmul.f32.vlgmr.msra.gmra.mxu1 %v72_v36  ;;  %v259_v36 = vld [vmem:[%s358_s2 + $0x5] ss:$0 sm:$0xff] }
  0xa4   :  { %234 = vmatpush.msrb.mxu0 %v209_v31 }
  0xa6   :  { %235 = vmatpush.msrb.mxu0 %v208_v32 }
  0xa8   :  { %236 = vmatpush.msrb.mxu0 %v207_v33 }
  0xaa   :  { %237 = vmatpush.msrb.mxu0 %v206_v34 }
  0xac   :  { %238 = vmatpush.msrb.mxu0 %v205_v35 }
 0x120   :  { %v108_v54 = vpop.f32.mrf.mxu1 }
 0x121   :  { %v109_v55 = vadd.f32 %v257_v53, %v108_v54 }
 0x123   :  { %v111_v56 = vsub.f32 0.0, %v109_v55 }
 0x125   :  { %v112_v57 = vmul.f32 1.442695, %v111_v56 }
 0x127   :  { %265 = vpow2.f32 %v112_v57 }
 0x12d   :  { %v266_v58 = vpop.eup %265 }
 0x12e   :  { %v114_v59 = vadd.f32 1.0, %v266_v58 }
 0x130   :  { %267 = vrcp.f32 %v114_v59 }
 0x136   :  { %v268_v60 = vpop.eup %267 }
 0x137   :  { %v116_v61 = vmul.f32 %v268_v60, %v109_v55 }
 0x139   :  { %151 = vmatmul.f32.vlgmr.msra.gmra.mxu2 %v116_v61 }
 0x1bc   :  { %v152_v15 = vpop.f32.mrf.mxu2 }
 0x1bd   :  { %v153_v16 = vadd.f32 %v258_v14, %v152_v15 }
 0x1bf   :  { %v155_v17 = vsub.f32 0.0, %v153_v16 }
 0x1c1   :  { %v156_v18 = vmul.f32 1.442695, %v155_v17 }
 0x1c3   :  { %269 = vpow2.f32 %v156_v18 }
 0x1c9   :  { %v270_v19 = vpop.eup %269 }
 0x1ca   :  { %v158_v20 = vadd.f32 1.0, %v270_v19 }
 0x1cc   :  { %271 = vrcp.f32 %v158_v20 }
 0x1d2   :  { %v272_v21 = vpop.eup %271 }
 0x1d3   :  { %v160_v22 = vmul.f32 %v272_v21, %v153_v16 }
 0x1d5   :  { %195 = vmatmul.f32.vlgmr.msra.gmra.mxu3 %v160_v22 }
 0x258   :  { %v196_v37 = vpop.f32.mrf.mxu3 }
 0x259   :  { %v197_v38 = vadd.f32 %v259_v36, %v196_v37 }
 0x25b   :  { %v199_v39 = vsub.f32 0.0, %v197_v38 }
 0x25d   :  { %v200_v40 = vmul.f32 1.442695, %v199_v39 }
 0x25f   :  { %273 = vpow2.f32 %v200_v40 }
 0x265   :  { %v274_v41 = vpop.eup %273 }
 0x266   :  { %v202_v42 = vadd.f32 1.0, %v274_v41 }
 0x268   :  { %275 = vrcp.f32 %v202_v42 }
 0x26e   :  { %v276_v43 = vpop.eup %275 }
 0x26f   :  { %v204_v44 = vmul.f32 %v276_v43, %v197_v38 }
 0x271   :  { %239 = vmatmul.f32.vlgmr.msrb.gmra.mxu0 %v204_v44 }
 0x2ee   :  { %v240_v46 = vpop.f32.mrf.mxu0 }
 0x2ef   :  { %v241_v47 = vadd.f32 %v260_v45, %v240_v46 }
 0x2f1   :  { %244 = vst.msk [vmem:[%s359_s3] sm:$0xff] %vm243_vm1, %v241_v47 }
 0x2f2   :  { %249 = vsyncpa [#allocation3], 1 }

</bundles_post_ra>
